<compile_context>
chip_gen: v7x
topology: tpu7x:2x2x1
jax: 0.10.0
libtpu: 0.0.40
codegen_flags: <defaults>
</compile_context>

<pallas_src>
import math
import functools

import jax
import jax.numpy as jnp
from jax.experimental import pallas as pl
from jax.experimental.pallas import tpu as pltpu

_LANE = 128
_SUBLANE = 8
# Budget for all double-buffered tiles (x, out, [bits]) + pe.  Conservative so
# it fits under every chip's default scoped VMEM (v5e 16 MiB, v6e/v7x 32 MiB).
_VMEM_BUDGET = 8 * 1024 * 1024


def _add_pe_kernel(x_ref, pe_ref, o_ref):
    # x_ref: (tB, tC); pe_ref: (1, tC) -> sublane-broadcast over the batch rows.
    o_ref[...] = (x_ref[...] + pe_ref[...]).astype(o_ref.dtype)


def _add_pe_dropout_kernel(x_ref, pe_ref, bits_ref, o_ref, *, threshold, inv_keep):
    y = x_ref[...] + pe_ref[...]
    # Integer-threshold dropout: keep with probability 1 - p (no float uniform
    # construction -> fewer VALU ops / shorter vreg live ranges).
    keep = bits_ref[...] >= jnp.uint32(threshold)
    o_ref[...] = jnp.where(keep, y * inv_keep, jnp.zeros_like(y)).astype(o_ref.dtype)


def make_pe_table(d_model, max_len=5000, dtype=jnp.float32):
    """Builds the sinusoidal table exactly like the PyTorch __init__."""
    position = jnp.arange(0, max_len, dtype=jnp.float32)[:, None]            # (L, 1)
    div_term = jnp.exp(jnp.arange(0, d_model, 2, dtype=jnp.float32)
                       * (-math.log(10000.0) / d_model))                      # (D/2,)
    pe = jnp.zeros((max_len, d_model), dtype=jnp.float32)
    pe = pe.at[:, 0::2].set(jnp.sin(position * div_term))
    pe = pe.at[:, 1::2].set(jnp.cos(position * div_term))
    return pe.astype(dtype)                                                   # (L, D)


def _pick_tiles(n_rows, n_cols, x_bytes, with_bits):
    """Pick (row_tile, col_tile) for the lane-dense 2-D view.

    rows -> sublane axis: multiple of 8 or the full extent.
    cols -> lane axis: multiple of 128 or the full extent, sized so the
    double-buffered tiles stay under _VMEM_BUDGET.
    """
    if n_rows <= _SUBLANE:
        t_rows = n_rows
    else:
        t_rows = min((n_rows // _SUBLANE) * _SUBLANE, 256)

    # 2 buffers each for x-in and out (+ uint32 bits in training) + 2 pe rows.
    bytes_per_col = 2 * t_rows * (2 * x_bytes + (4 if with_bits else 0)) + 2 * x_bytes
    max_cols = max(_LANE, _VMEM_BUDGET // bytes_per_col)
    if n_cols <= max_cols:
        t_cols = n_cols                       # full extent (always legal)
    else:
        t_cols = (max_cols // _LANE) * _LANE  # lane-dense multiple of 128
    return t_rows, t_cols


def positional_encoding(x, pe, *, dropout_p=0.1, training=False, seed=0):
    """x: (B, S, D) float; pe: (max_len, D).  Returns (B, S, D)."""
    B, S, D = x.shape
    C = S * D
    use_dropout = bool(training) and float(dropout_p) > 0.0

    # Lane-dense 2-D views (free, row-major metadata reshape).
    x2d = x.reshape(B, C)
    pe2d = pe[:S, :].astype(x.dtype).reshape(1, C)   # cast to activation dtype

    x_bytes = jnp.dtype(x.dtype).itemsize
    tB, tC = _pick_tiles(B, C, x_bytes, use_dropout)
    # Batch innermost -> pe tile is fetched exactly once per column tile.
    grid = (pl.cdiv(C, tC), pl.cdiv(B, tB))

    x_spec = pl.BlockSpec((tB, tC), lambda c, b: (b, c))
    pe_spec = pl.BlockSpec((1, tC), lambda c, b: (0, c))
    out_spec = pl.BlockSpec((tB, tC), lambda c, b: (b, c))

    cparams = pltpu.CompilerParams(
        dimension_semantics=("parallel", "parallel"),
        vmem_limit_bytes=32 * 1024 * 1024,
    )

    if use_dropout:
        p = float(dropout_p)
        threshold = min(int(round(p * (1 << 32))), (1 << 32) - 1)
        bits = jax.random.bits(jax.random.PRNGKey(seed), (B, C), dtype=jnp.uint32)
        kernel = functools.partial(_add_pe_dropout_kernel,
                                   threshold=threshold,
                                   inv_keep=1.0 / (1.0 - p))
        out2d = pl.pallas_call(
            kernel,
            out_shape=jax.ShapeDtypeStruct((B, C), x.dtype),
            grid=grid,
            in_specs=[x_spec, pe_spec,
                      pl.BlockSpec((tB, tC), lambda c, b: (b, c))],
            out_specs=out_spec,
            compiler_params=cparams,
        )(x2d, pe2d, bits)
    else:
        out2d = pl.pallas_call(
            _add_pe_kernel,
            out_shape=jax.ShapeDtypeStruct((B, C), x.dtype),
            grid=grid,
            in_specs=[x_spec, pe_spec],
            out_specs=out_spec,
            compiler_params=cparams,
        )(x2d, pe2d)

    return out2d.reshape(B, S, D)


if __name__ == "__main__":
    # Small shapes consistent with the module's forward: batch=2, seq=8, d_model=32
    B, S, D = 2, 8, 32
    max_len = 64
    key = jax.random.PRNGKey(0)
    x = jax.random.normal(key, (B, S, D), dtype=jnp.float32)

    pe = make_pe_table(D, max_len)
    ref = x + pe[:S, :][None, :, :]

    # Eval mode (dropout is identity) -- exact semantics vs. plain JAX.
    out_eval = jax.block_until_ready(
        positional_encoding(x, pe, dropout_p=0.1, training=False))
    assert out_eval.shape == (B, S, D)
    assert jnp.allclose(out_eval, ref, atol=1e-6), "eval-mode mismatch"

    # Training mode (dropout active, deterministic per seed).
    out_train = jax.block_until_ready(
        positional_encoding(x, pe, dropout_p=0.1, training=True, seed=1234))
    assert out_train.shape == (B, S, D)
    # Surviving elements are scaled by 1/(1-p); dropped elements are exactly 0.
    nonzero = out_train != 0
    assert jnp.allclose(jnp.where(nonzero, out_train, 0.0),
                        jnp.where(nonzero, ref / 0.9, 0.0), atol=1e-5)
    assert int(nonzero.sum()) > 0, "dropout with p=0.1 dropped everything"

    print("KERNEL_OK")
</pallas_src>

<mosaic_0001>
module attributes {stable_mosaic.version = 11 : i64} {
  func.func @_add_pe_kernel(%arg0: i32, %arg1: i32, %arg2: memref<2x256xf32, #tpu.memory_space<vmem>>, %arg3: memref<1x256xf32, #tpu.memory_space<vmem>>, %arg4: memref<2x256xf32, #tpu.memory_space<vmem>>) attributes {dimension_semantics = [#tpu.dimension_semantics<parallel>, #tpu.dimension_semantics<parallel>], iteration_bounds = array<i64: 1, 1>, scalar_prefetch = 0 : i64, scratch_operands = 0 : i64, tpu.core_type = #tpu.core_type<tc>, window_params = [{transform_indices = @transform_0, window_bounds = array<i64: 2, 256>}, {transform_indices = @transform_1, window_bounds = array<i64: 1, 256>}, {transform_indices = @transform_2, window_bounds = array<i64: 2, 256>}]} {
    %c0 = arith.constant 0 : index
    %c0_0 = arith.constant 0 : index
    %0 = vector.load %arg2[%c0, %c0_0] : memref<2x256xf32, #tpu.memory_space<vmem>>, vector<2x256xf32>
    %c0_1 = arith.constant 0 : index
    %c0_2 = arith.constant 0 : index
    %1 = vector.load %arg3[%c0_1, %c0_2] : memref<1x256xf32, #tpu.memory_space<vmem>>, vector<1x256xf32>
    %2 = vector.broadcast %1 : vector<1x256xf32> to vector<2x256xf32>
    %3 = arith.addf %0, %2 : vector<2x256xf32>
    %c0_3 = arith.constant 0 : index
    %c0_4 = arith.constant 0 : index
    %4 = vector.load %arg4[%c0_3, %c0_4] : memref<2x256xf32, #tpu.memory_space<vmem>>, vector<2x256xf32>
    tpu.vector_store %arg4[%c0_3, %c0_4], %3 {strides = array<i32>} : memref<2x256xf32, #tpu.memory_space<vmem>>, vector<2x256xf32>,
    return
  }
  func.func @transform_0(%arg0: i32, %arg1: i32) -> (i32, i32) {
    %c0_i32 = arith.constant 0 : i32
    return %arg1, %arg0 : i32, i32
  }
  func.func @transform_1(%arg0: i32, %arg1: i32) -> (i32, i32) {
    %c0_i32 = arith.constant 0 : i32
    %c0_i32_0 = arith.constant 0 : i32
    return %c0_i32, %arg0 : i32, i32
  }
  func.func @transform_2(%arg0: i32, %arg1: i32) -> (i32, i32) {
    %c0_i32 = arith.constant 0 : i32
    return %arg1, %arg0 : i32, i32
  }
}

</mosaic_0001>

<bundles_post_ra>
// kernel: tpu_custom_call.1
= control target key start
LH: loop header
LB: loop body
LE: loop exit
PB: predicated region body
PF: predicated region fallthrough
CT: control target
= control target key end

     0   :  { %7 = vsyncpa [#allocation3], 0  ;;  %s157_s0 = inlined_call_operand.hbm [shape: f32[2,256], index: 0, kind: input, shape index: {}]   ;;  %s158_s1 = inlined_call_operand.vmem [shape: f32[1,256], index: 1, kind: input, shape index: {}]   ;;  %s159_s2 = inlined_call_operand.hbm [shape: f32[2,256], index: 2, kind: output, shape index: {}]  }
   0x1   :  { %8 = vsyncpa [#allocation4], 0  ;;  %s112_s9 = smov [#allocation2]   ;;  %s64_s13 = scalar_lea.hbm %s157_s0, 64 }
   0x2   :  { %s15_s10 = sshll.u32 %s112_s9, 4  ;;  %p65_p0 = scmp.ne.s32.totalorder %s157_s0, %s64_s13  ;;  %s16_s10 = int_to_ptr.vmem [resolvable:$true] %s15_s10 }
   0x3   :  { %p68_p1 = scmp.lt.u32.totalorder %s64_s13, %s157_s0 }
   0x5   :  { %p70_p2 = pnand %p68_p1, %p65_p0 }
   0x7   :  { %73 = shalt.err (!%p70_p2)
}
   0x8   :  { %s74_s18 = scalar_lea.vmem %s16_s10, 64  ;;  %p79_p4 = scmp.lt.s32.totalorder %s16_s10, %s16_s10 }
   0x9   :  { %p75_p3 = scmp.ne.s32.totalorder %s16_s10, %s74_s18  ;;  %p80_p5 = scmp.lt.s32.totalorder %s74_s18, %s74_s18 }
   0xb   :  { %p81_p6 = por %p80_p5, %p79_p4 }
   0xd   :  { %p82_p7 = pnand %p81_p6, %p75_p3 }
   0xf   :  { %85 = shalt.err (!%p82_p7)
}
  0x10   :  { %18 = dma.hbm_to_vmem [thread:$0]  %s157_s0, 64, %s16_s10, [#allocation3]  }
  0x11   :  { %108 = dma.done.wait [#allocation3], 64  }
  0x12   :  { %109 = vsyncadd [#allocation3], 4294967232  ;;  %v27_v0 = vlaneseq  ;;  %v113_v1 = vmov 1983009808   ;;  %v25_v7 = vld [vmem:[%s158_s1] sm:$0x3] }
  0x13   :  { %v37_v2 = vunpack.c.l.s4 %v113_v1  ;;  %v24_v12 = vld [vmem:[#allocation2] sm:$0xf]  ;;  %s114_s23 = smov [#allocation5]  }
  0x14   :  { %v28_v3 = vshrl.u32 %v27_v0, 7  ;;  %s52_s0 = sshll.u32 %s114_s23, 4  ;;  %s53_s0 = int_to_ptr.vmem [resolvable:$true] %s52_s0 }
  0x15   :  { %v38_v6 = vunpack.c.0.s8 %v37_v2  ;;  %s86_s24 = scalar_lea.vmem %s53_s0, 64  ;;  %p91_p9 = scmp.lt.s32.totalorder %s53_s0, %s53_s0 }
  0x16   :  { %v29_v4 = vsub.s32 0, %v28_v3  ;;  %v33_v5 = vsub.s32 1, %v28_v3  ;;  %p87_p8 = scmp.ne.s32.totalorder %s53_s0, %s86_s24  ;;  %p92_p10 = scmp.lt.s32.totalorder %s86_s24, %s86_s24 }
  0x17   :  { %v41_v10 = vsub.s32 %v38_v6, %v28_v3 }
  0x18   :  { %v30_v8 = vrot.slane %v25_v7, %v29_v4  ;;  %v34_v9 = vrot.slane %v25_v7, %v33_v5  ;;  %p93_p11 = por %p92_p10, %p91_p9 }
  0x1a   :  { %v35_v11 = vcombine.low %v30_v8, %v34_v9  ;;  %p94_p12 = pnand %p93_p11, %p87_p8 }
  0x1c   :  { %v42_v13 = vrot.slane %v35_v11, %v41_v10 }
  0x1e   :  { %v44_v14 = vadd.f32 %v42_v13, %v24_v12 }
  0x20   :  { %45 = vst [vmem:[#allocation5] sm:$0xf] %v44_v14 }
  0x21   :  { %97 = shalt.err (!%p94_p12)
}
  0x22   :  { %s98_s26 = scalar_lea.hbm %s159_s2, 64 }
  0x23   :  { %p99_p13 = scmp.ne.s32.totalorder %s159_s2, %s98_s26  ;;  %p102_p0 = scmp.lt.u32.totalorder %s98_s26, %s159_s2 }
  0x25   :  { %p104_p1 = pnand %p102_p0, %p99_p13 }
  0x27   :  { %107 = shalt.err (!%p104_p1)
}
  0x28   :  { %55 = dma.vmem_to_hbm [thread:$0]  %s53_s0, 64, %s159_s2, [#allocation4]  }
  0x29   :  { %110 = dma.done.wait [#allocation4], 64  }
  0x2a   :  { %111 = vsyncadd [#allocation4], 4294967232 }
  0x2b   :  { %59 = vsyncpa [#allocation3], 1 }
  0x2c   :  { %60 = vsyncpa [#allocation4], 1 }

</bundles_post_ra>
